<compile_context>
chip_gen: v7x
topology: tpu7x:2x2x1
jax: 0.10.0
libtpu: 0.0.40
codegen_flags: <defaults>
</compile_context>

<pallas_src>
import functools

import jax
import jax.numpy as jnp
from jax.experimental import pallas as pl
from jax.experimental.pallas import tpu as pltpu


def _piu_kernel(node_ref, vec_ref, w_uv_ref, w1_ref, b1_ref, w2_ref, b2_ref,
                out_ref):
    node = node_ref[...]                               # (tn, F)
    vec = vec_ref[...]                                 # (3, tn, F)
    three, tn, F = vec.shape
    H = w1_ref.shape[1]

    # --- fused vector channel mixing: one (3*tn, F) @ (F, 2H) matmul --------
    # tile_n is a multiple of 8, so merging the (3, tn) leading dims is a
    # no-op relayout (no hidden VMEM copy).
    vec2d = vec.reshape(three * tn, F)
    uv = jnp.dot(vec2d, w_uv_ref[...],
                 preferred_element_type=jnp.float32)   # (3*tn, 2H) f32
    uv = uv.reshape(three, tn, 2 * H)
    vec_u = uv[:, :, :H]                               # (3, tn, H)
    vec_v = uv[:, :, H:]                               # (3, tn, H)

    # --- scalar invariants ---------------------------------------------------
    uv_prod = jnp.sum(vec_u * vec_v, axis=0)                    # (tn, H)
    v_norm = jnp.sqrt(jnp.sum(vec_v * vec_v, axis=0))           # (tn, H)

    # --- node MLP: concat(node, ||v||) -> Linear -> SiLU -> Linear(3H) ------
    x = jnp.concatenate([node.astype(jnp.float32), v_norm], axis=1)  # (tn, F+H)
    h = (jnp.dot(x.astype(w1_ref.dtype), w1_ref[...],
                 preferred_element_type=jnp.float32)
         + b1_ref[...])                                         # (tn, H) f32
    h = h * jax.nn.sigmoid(h)                                   # SiLU

    abc = (jnp.dot(h.astype(w2_ref.dtype), w2_ref[...],
                   preferred_element_type=jnp.float32)
           + b2_ref[...])                                       # (tn, 3H)
    a = abc[:, :H]
    b = abc[:, H:2 * H]
    c = abc[:, 2 * H:]

    # --- gated updates, packed into one lane-dense slab ----------------------
    node_update = uv_prod * b + c                               # (tn, H)
    vec_scaled = vec_u * a[None, :, :]                          # (3, tn, H)

    out_ref[...] = jnp.concatenate(
        [node_update, vec_scaled[0], vec_scaled[1], vec_scaled[2]],
        axis=1).astype(out_ref.dtype)                           # (tn, 4H)


def _choose_tile_n(n):
    """Largest row tile up to 1024, multiple of 8 (sublane)."""
    t = min(n, 1024)
    t = max(8, (t // 8) * 8)
    return t


@functools.partial(jax.jit, static_argnames=("tile_n", "compute_dtype"))
def polarizable_interaction_update(node_feat, vec_feat, params, *,
                                   tile_n=None, compute_dtype=jnp.float32):
    """Forward pass.

    node_feat: (N, F) float.
    vec_feat : (N, F, 3) float (PyTorch layout).
    Returns (node_update (N, H), vec_update (N, H, 3)) matching the module.
    compute_dtype=jnp.bfloat16 halves HBM traffic / doubles MXU rate on
    v6e/v7x (f32 accumulation is kept); default f32 for bit-tight checks.
    """
    N, F = node_feat.shape
    H = params["w1"].shape[1]
    out_dtype = node_feat.dtype

    if tile_n is None:
        tile_n = _choose_tile_n(N)
    assert tile_n % 8 == 0, "tile_n must be a multiple of 8 (sublane)"

    # Pad rows so the grid is exact; padded rows are discarded afterwards.
    n_tiles = pl.cdiv(N, tile_n)
    Np = n_tiles * tile_n
    pad = Np - N

    vec_cnf = jnp.transpose(vec_feat, (2, 0, 1))        # (3, N, F)
    node_p = node_feat
    if pad:
        node_p = jnp.pad(node_feat, ((0, pad), (0, 0)))
        vec_cnf = jnp.pad(vec_cnf, ((0, 0), (0, pad), (0, 0)))

    node_p = node_p.astype(compute_dtype)
    vec_cnf = vec_cnf.astype(compute_dtype)
    w_uv = params["w_uv"].astype(compute_dtype)          # (F, 2H)
    w1 = params["w1"].astype(compute_dtype)              # (F+H, H)
    w2 = params["w2"].astype(compute_dtype)              # (H, 3H)
    b1 = params["b1"].astype(jnp.float32)                # (1, H)
    b2 = params["b2"].astype(jnp.float32)                # (1, 3H)

    const2d = lambda i: (0, 0)
    in_specs = [
        pl.BlockSpec((tile_n, F), lambda i: (i, 0)),           # node
        pl.BlockSpec((3, tile_n, F), lambda i: (0, i, 0)),     # vec (3, N, F)
        pl.BlockSpec((F, 2 * H), const2d),                     # w_uv (resident)
        pl.BlockSpec((F + H, H), const2d),                     # w1
        pl.BlockSpec((1, H), const2d),                         # b1
        pl.BlockSpec((H, 3 * H), const2d),                     # w2
        pl.BlockSpec((1, 3 * H), const2d),                     # b2
    ]
    out_specs = pl.BlockSpec((tile_n, 4 * H), lambda i: (i, 0))
    out_shape = jax.ShapeDtypeStruct((Np, 4 * H), out_dtype)

    slab = pl.pallas_call(
        _piu_kernel,
        grid=(n_tiles,),
        in_specs=in_specs,
        out_specs=out_specs,
        out_shape=out_shape,
        compiler_params=pltpu.CompilerParams(
            dimension_semantics=("parallel",)),     # shards across TCs on v7x
    )(node_p, vec_cnf, w_uv, w1, b1, w2, b2)

    slab = slab[:N]
    node_update = slab[:, :H]
    # Split the packed slab back into the PyTorch layout (N, H, 3).
    vec_update = jnp.transpose(slab[:, H:].reshape(N, 3, H), (0, 2, 1))
    return node_update, vec_update


def init_params(key, input_nf, hidden_nf):
    """Deterministic synthetic parameters, stored pre-fused (y = x @ W)."""
    ks = jax.random.split(key, 6)
    F, H = input_nf, hidden_nf
    s = lambda fan_in: 1.0 / jnp.sqrt(fan_in)
    w_u = jax.random.normal(ks[0], (F, H), jnp.float32) * s(F)
    w_v = jax.random.normal(ks[1], (F, H), jnp.float32) * s(F)
    w1 = jax.random.normal(ks[2], (F + H, H), jnp.float32) * s(F + H)
    b1 = jax.random.normal(ks[3], (1, H), jnp.float32) * 0.01
    w2 = jax.random.normal(ks[4], (H, 3 * H), jnp.float32) * s(H)
    b2 = jax.random.normal(ks[5], (1, 3 * H), jnp.float32) * 0.01
    return {
        "w_uv": jnp.concatenate([w_u, w_v], axis=1),   # (F, 2H)
        "w1": w1,                                       # (F+H, H)
        "b1": b1,                                       # (1, H)
        "w2": w2,                                       # (H, 3H)
        "b2": b2,                                       # (1, 3H)
    }


def reference(node_feat, vec_feat, params):
    """Pure-JAX replica of the PyTorch forward (eval mode)."""
    H = params["w1"].shape[1]
    w_u = params["w_uv"][:, :H]
    w_v = params["w_uv"][:, H:]
    vec_u = jnp.einsum("nfc,fh->nhc", vec_feat, w_u)
    vec_v = jnp.einsum("nfc,fh->nhc", vec_feat, w_v)
    uv_prod = jnp.sum(vec_u * vec_v, axis=-1)
    v_norm = jnp.linalg.norm(vec_v, axis=-1)
    x = jnp.concatenate([node_feat, v_norm], axis=1)
    h = x @ params["w1"] + params["b1"][0]
    h = h * jax.nn.sigmoid(h)
    out = h @ params["w2"] + params["b2"][0]
    vec_update = vec_u * out[:, :H, None]
    node_update = uv_prod * out[:, H:2 * H] + out[:, 2 * H:]
    return node_update, vec_update


if __name__ == "__main__":
    N, input_nf, hidden_nf = 16, 32, 32

    key = jax.random.PRNGKey(0)
    k_node, k_vec, k_par = jax.random.split(key, 3)
    node_feat = jax.random.normal(k_node, (N, input_nf), jnp.float32)
    vec_feat = jax.random.normal(k_vec, (N, input_nf, 3), jnp.float32)
    params = init_params(k_par, input_nf, hidden_nf)

    node_update, vec_update = polarizable_interaction_update(
        node_feat, vec_feat, params)
    jax.block_until_ready((node_update, vec_update))

    node_ref, vec_ref = reference(node_feat, vec_feat, params)
    assert node_update.shape == (N, hidden_nf)
    assert vec_update.shape == (N, hidden_nf, 3)
    assert jnp.allclose(node_update, node_ref, rtol=1e-4, atol=1e-4)
    assert jnp.allclose(vec_update, vec_ref, rtol=1e-4, atol=1e-4)

    print("KERNEL_OK")
</pallas_src>

<mosaic_0001>
module attributes {stable_mosaic.version = 11 : i64} {
  func.func @_piu_kernel(%arg0: i32, %arg1: memref<16x32xf32, #tpu.memory_space<vmem>>, %arg2: memref<3x16x32xf32, #tpu.memory_space<vmem>>, %arg3: memref<32x64xf32, #tpu.memory_space<vmem>>, %arg4: memref<64x32xf32, #tpu.memory_space<vmem>>, %arg5: memref<1x32xf32, #tpu.memory_space<vmem>>, %arg6: memref<32x96xf32, #tpu.memory_space<vmem>>, %arg7: memref<1x96xf32, #tpu.memory_space<vmem>>, %arg8: memref<16x128xf32, #tpu.memory_space<vmem>>) attributes {dimension_semantics = [#tpu.dimension_semantics<parallel>], iteration_bounds = array<i64: 1>, scalar_prefetch = 0 : i64, scratch_operands = 0 : i64, tpu.core_type = #tpu.core_type<tc>, window_params = [{transform_indices = @transform_0, window_bounds = array<i64: 16, 32>}, {transform_indices = @transform_1, window_bounds = array<i64: 3, 16, 32>}, {pipeline_mode = #tpu.pipeline_mode<synchronous>, transform_indices = @transform_2, window_bounds = array<i64: 32, 64>}, {pipeline_mode = #tpu.pipeline_mode<synchronous>, transform_indices = @transform_3, window_bounds = array<i64: 64, 32>}, {pipeline_mode = #tpu.pipeline_mode<synchronous>, transform_indices = @transform_4, window_bounds = array<i64: 1, 32>}, {pipeline_mode = #tpu.pipeline_mode<synchronous>, transform_indices = @transform_5, window_bounds = array<i64: 32, 96>}, {pipeline_mode = #tpu.pipeline_mode<synchronous>, transform_indices = @transform_6, window_bounds = array<i64: 1, 96>}, {transform_indices = @transform_7, window_bounds = array<i64: 16, 128>}]} {
    %c0 = arith.constant 0 : index
    %c0_0 = arith.constant 0 : index
    %0 = vector.load %arg1[%c0, %c0_0] : memref<16x32xf32, #tpu.memory_space<vmem>>, vector<16x32xf32>
    %c0_1 = arith.constant 0 : index
    %c0_2 = arith.constant 0 : index
    %c0_3 = arith.constant 0 : index
    %1 = vector.load %arg2[%c0_1, %c0_2, %c0_3] : memref<3x16x32xf32, #tpu.memory_space<vmem>>, vector<3x16x32xf32>
    %2 = vector.shape_cast %1 : vector<3x16x32xf32> to vector<48x32xf32>
    %c0_4 = arith.constant 0 : index
    %c0_5 = arith.constant 0 : index
    %3 = vector.load %arg3[%c0_4, %c0_5] : memref<32x64xf32, #tpu.memory_space<vmem>>, vector<32x64xf32>
    %cst = arith.constant dense<0.000000e+00> : vector<48x64xf32>
    %4 = tpu.matmul %2, %3, %cst {dimension_numbers = #tpu.dot_dimension_numbers<[1], [0], [0], [1], [0, 0, 1, 1], [], []>} : vector<48x32xf32>, vector<32x64xf32>, vector<48x64xf32> -> vector<48x64xf32>
    %5 = vector.shape_cast %4 : vector<48x64xf32> to vector<3x16x64xf32>
    %6 = vector.extract_strided_slice %5 {offsets = [0, 0, 0], sizes = [3, 16, 32], strides = [1, 1, 1]} : vector<3x16x64xf32> to vector<3x16x32xf32>
    %7 = vector.extract_strided_slice %5 {offsets = [0, 0, 32], sizes = [3, 16, 32], strides = [1, 1, 1]} : vector<3x16x64xf32> to vector<3x16x32xf32>
    %8 = arith.mulf %6, %7 : vector<3x16x32xf32>
    %cst_6 = arith.constant dense<0.000000e+00> : vector<16x32xf32>
    %9 = vector.multi_reduction <add>, %8, %cst_6 [0] : vector<3x16x32xf32> to vector<16x32xf32>
    %10 = arith.mulf %7, %7 : vector<3x16x32xf32>
    %cst_7 = arith.constant dense<0.000000e+00> : vector<16x32xf32>
    %11 = vector.multi_reduction <add>, %10, %cst_7 [0] : vector<3x16x32xf32> to vector<16x32xf32>
    %12 = math.sqrt %11 : vector<16x32xf32>
    %13 = tpu.concatenate %0, %12 in 1 : vector<16x32xf32>, vector<16x32xf32> -> vector<16x64xf32>
    %c0_8 = arith.constant 0 : index
    %c0_9 = arith.constant 0 : index
    %14 = vector.load %arg4[%c0_8, %c0_9] : memref<64x32xf32, #tpu.memory_space<vmem>>, vector<64x32xf32>
    %cst_10 = arith.constant dense<0.000000e+00> : vector<16x32xf32>
    %15 = tpu.matmul %13, %14, %cst_10 {dimension_numbers = #tpu.dot_dimension_numbers<[1], [0], [0], [1], [0, 0, 1, 1], [], []>} : vector<16x64xf32>, vector<64x32xf32>, vector<16x32xf32> -> vector<16x32xf32>
    %c0_11 = arith.constant 0 : index
    %c0_12 = arith.constant 0 : index
    %16 = vector.load %arg5[%c0_11, %c0_12] : memref<1x32xf32, #tpu.memory_space<vmem>>, vector<1x32xf32>
    %17 = vector.broadcast %16 : vector<1x32xf32> to vector<16x32xf32>
    %18 = arith.addf %15, %17 : vector<16x32xf32>
    %19 = arith.negf %18 : vector<16x32xf32>
    %20 = math.exp %19 : vector<16x32xf32>
    %cst_13 = arith.constant 1.000000e+00 : f32
    %21 = vector.broadcast %cst_13 : f32 to vector<16x32xf32>
    %22 = arith.addf %21, %20 : vector<16x32xf32>
    %23 = arith.divf %21, %22 : vector<16x32xf32>
    %24 = arith.mulf %18, %23 : vector<16x32xf32>
    %c0_14 = arith.constant 0 : index
    %c0_15 = arith.constant 0 : index
    %25 = vector.load %arg6[%c0_14, %c0_15] : memref<32x96xf32, #tpu.memory_space<vmem>>, vector<32x96xf32>
    %cst_16 = arith.constant dense<0.000000e+00> : vector<16x96xf32>
    %26 = tpu.matmul %24, %25, %cst_16 {dimension_numbers = #tpu.dot_dimension_numbers<[1], [0], [0], [1], [0, 0, 1, 1], [], []>} : vector<16x32xf32>, vector<32x96xf32>, vector<16x96xf32> -> vector<16x96xf32>
    %c0_17 = arith.constant 0 : index
    %c0_18 = arith.constant 0 : index
    %27 = vector.load %arg7[%c0_17, %c0_18] : memref<1x96xf32, #tpu.memory_space<vmem>>, vector<1x96xf32>
    %28 = vector.broadcast %27 : vector<1x96xf32> to vector<16x96xf32>
    %29 = arith.addf %26, %28 : vector<16x96xf32>
    %30 = vector.extract_strided_slice %29 {offsets = [0, 0], sizes = [16, 32], strides = [1, 1]} : vector<16x96xf32> to vector<16x32xf32>
    %31 = vector.extract_strided_slice %29 {offsets = [0, 32], sizes = [16, 32], strides = [1, 1]} : vector<16x96xf32> to vector<16x32xf32>
    %32 = vector.extract_strided_slice %29 {offsets = [0, 64], sizes = [16, 32], strides = [1, 1]} : vector<16x96xf32> to vector<16x32xf32>
    %33 = arith.mulf %9, %31 : vector<16x32xf32>
    %34 = arith.addf %33, %32 : vector<16x32xf32>
    %35 = vector.shape_cast %30 : vector<16x32xf32> to vector<1x16x32xf32>
    %36 = vector.broadcast %35 : vector<1x16x32xf32> to vector<3x16x32xf32>
    %37 = arith.mulf %6, %36 : vector<3x16x32xf32>
    %38 = vector.extract_strided_slice %37 {offsets = [0, 0, 0], sizes = [1, 16, 32], strides = [1, 1, 1]} : vector<3x16x32xf32> to vector<1x16x32xf32>
    %39 = vector.shape_cast %38 : vector<1x16x32xf32> to vector<16x32xf32>
    %40 = vector.extract_strided_slice %37 {offsets = [1, 0, 0], sizes = [1, 16, 32], strides = [1, 1, 1]} : vector<3x16x32xf32> to vector<1x16x32xf32>
    %41 = vector.shape_cast %40 : vector<1x16x32xf32> to vector<16x32xf32>
    %42 = vector.extract_strided_slice %37 {offsets = [2, 0, 0], sizes = [1, 16, 32], strides = [1, 1, 1]} : vector<3x16x32xf32> to vector<1x16x32xf32>
    %43 = vector.shape_cast %42 : vector<1x16x32xf32> to vector<16x32xf32>
    %44 = tpu.concatenate %34, %39, %41, %43 in 1 : vector<16x32xf32>, vector<16x32xf32>, vector<16x32xf32>, vector<16x32xf32> -> vector<16x128xf32>
    %c0_19 = arith.constant 0 : index
    %c0_20 = arith.constant 0 : index
    %45 = vector.load %arg8[%c0_19, %c0_20] : memref<16x128xf32, #tpu.memory_space<vmem>>, vector<16x128xf32>
    tpu.vector_store %arg8[%c0_19, %c0_20], %44 {strides = array<i32>} : memref<16x128xf32, #tpu.memory_space<vmem>>, vector<16x128xf32>,
    return
  }
  func.func @transform_0(%arg0: i32) -> (i32, i32) {
    %c0_i32 = arith.constant 0 : i32
    %c0_i32_0 = arith.constant 0 : i32
    return %arg0, %c0_i32 : i32, i32
  }
  func.func @transform_1(%arg0: i32) -> (i32, i32, i32) {
    %c0_i32 = arith.constant 0 : i32
    %c0_i32_0 = arith.constant 0 : i32
    %c0_i32_1 = arith.constant 0 : i32
    return %c0_i32, %arg0, %c0_i32_0 : i32, i32, i32
  }
  func.func @transform_2(%arg0: i32) -> (i32, i32) {
    %c0_i32 = arith.constant 0 : i32
    %c0_i32_0 = arith.constant 0 : i32
    %c0_i32_1 = arith.constant 0 : i32
    return %c0_i32, %c0_i32_0 : i32, i32
  }
  func.func @transform_3(%arg0: i32) -> (i32, i32) {
    %c0_i32 = arith.constant 0 : i32
    %c0_i32_0 = arith.constant 0 : i32
    %c0_i32_1 = arith.constant 0 : i32
    return %c0_i32, %c0_i32_0 : i32, i32
  }
  func.func @transform_4(%arg0: i32) -> (i32, i32) {
    %c0_i32 = arith.constant 0 : i32
    %c0_i32_0 = arith.constant 0 : i32
    %c0_i32_1 = arith.constant 0 : i32
    return %c0_i32, %c0_i32_0 : i32, i32
  }
  func.func @transform_5(%arg0: i32) -> (i32, i32) {
    %c0_i32 = arith.constant 0 : i32
    %c0_i32_0 = arith.constant 0 : i32
    %c0_i32_1 = arith.constant 0 : i32
    return %c0_i32, %c0_i32_0 : i32, i32
  }
  func.func @transform_6(%arg0: i32) -> (i32, i32) {
    %c0_i32 = arith.constant 0 : i32
    %c0_i32_0 = arith.constant 0 : i32
    %c0_i32_1 = arith.constant 0 : i32
    return %c0_i32, %c0_i32_0 : i32, i32
  }
  func.func @transform_7(%arg0: i32) -> (i32, i32) {
    %c0_i32 = arith.constant 0 : i32
    %c0_i32_0 = arith.constant 0 : i32
    return %arg0, %c0_i32 : i32, i32
  }
}

</mosaic_0001>

<bundles_post_ra>
// kernel: polarizable_interaction_update.1
= control target key start
LH: loop header
LB: loop body
LE: loop exit
PB: predicated region body
PF: predicated region fallthrough
CT: control target
= control target key end

     0   :  { %12 = vsyncpa [#allocation3], 0  ;;  %s665_s24 = smov [#allocation2]   ;;  %s884_s0 = inlined_call_operand.hbm [shape: f32[16,32], index: 0, kind: input, shape index: {}]   ;;  %s885_s1 = inlined_call_operand.vmem [shape: f32[3,16,32], index: 1, kind: input, shape index: {}]   ;;  %s886_s2 = inlined_call_operand.vmem [shape: f32[32,64], index: 2, kind: input, shape index: {}]   ;;  %s887_s3 = inlined_call_operand.vmem [shape: f32[64,32], index: 3, kind: input, shape index: {}]   ;;  %s888_s4 = inlined_call_operand.vmem [shape: f32[1,32], index: 4, kind: input, shape index: {}]   ;;  %s889_s5 = inlined_call_operand.vmem [shape: f32[32,96], index: 5, kind: input, shape index: {}]   ;;  %s890_s6 = inlined_call_operand.vmem [shape: f32[1,96], index: 6, kind: input, shape index: {}]   ;;  %s891_s7 = inlined_call_operand.vmem [shape: f32[16,128], index: 7, kind: output, shape index: {}]  }
   0x1   :  { %s18_s25 = sshll.u32 %s665_s24, 4  ;;  %s641_s28 = scalar_lea.hbm %s884_s0, 256  ;;  %s19_s25 = int_to_ptr.vmem [resolvable:$true] %s18_s25 }
   0x2   :  { %p642_p0 = scmp.ne.s32.totalorder %s884_s0, %s641_s28  ;;  %p645_p1 = scmp.lt.u32.totalorder %s641_s28, %s884_s0 }
   0x4   :  { %p647_p2 = pnand %p645_p1, %p642_p0 }
   0x6   :  { %650 = shalt.err (!%p647_p2)
}
   0x7   :  { %s651_s10 = scalar_lea.vmem %s19_s25, 256  ;;  %p656_p4 = scmp.lt.s32.totalorder %s19_s25, %s19_s25 }
   0x8   :  { %p652_p3 = scmp.ne.s32.totalorder %s19_s25, %s651_s10  ;;  %p657_p5 = scmp.lt.s32.totalorder %s651_s10, %s651_s10 }
   0xa   :  { %p658_p6 = por %p657_p5, %p656_p4 }
   0xc   :  { %p659_p7 = pnand %p658_p6, %p652_p3 }
   0xe   :  { %662 = shalt.err (!%p659_p7)
}
   0xf   :  { %s666_s11 = smov 128   ;;  %s667_s12 = smov 8  }
  0x10   :  { %24 = dma.hbm_to_vmem [thread:$0]  %s884_s0, 256, %s19_s25, [#allocation3], %s666_s11, %s666_s11, %s667_s12  }
  0x11   :  { %663 = dma.done.wait [#allocation3], 256  }
  0x12   :  { %664 = vsyncadd [#allocation3], 4294967040  ;;  %vm52_vm0 = vcmask 261120   ;;  %v48_v0 = vld [vmem:[%s886_s2] sm:$0xff]  ;;  %v49_v1 = vld [vmem:[%s886_s2 + $0x8] sm:$0xff]  ;;  %s668_s24 = smov 96  }
  0x13   :  { %v50_v2 = vld [vmem:[%s886_s2 + $0x10] sm:$0xff]  ;;  %v591_v3 = vpack.c.bf16 %v49_v1, %v48_v0  ;;  %v51_v4 = vld [vmem:[%s886_s2 + $0x18] sm:$0xff]  ;;  %v42_v5 = vld [vmem:[%s885_s1] sm:$0xff]  ;;  %vm212_vm1 = vcmask 523520   ;;  %vm254_vm6 = vcmask 523264   ;;  %s670_s10 = smov 32  }
  0x14   :  { %v595_v6 = vpack.c.bf16 %v51_v4, %v50_v2  ;;  %552 = vmatprep.mubr.msk.f32.mxu0 %vm52_vm0, %v42_v5  ;;  %v43_v7 = vld [vmem:[%s885_s1 + $0x8] sm:$0xff]  ;;  %v44_v8 = vld [vmem:[%s885_s1 + $0x10] sm:$0xff]  ;;  %v45_v9 = vld [vmem:[%s885_s1 + $0x18] sm:$0xff]  ;;  %vm494_vm7 = vcmask 785408  }
  0x15   :  { %592 = vmatprep.subr.bf16.mxu0 %v591_v3  ;;  %v46_v10 = vld [vmem:[%s885_s1 + $0x20] sm:$0xff]  ;;  %v47_v11 = vld [vmem:[%s885_s1 + $0x28] sm:$0xff]  ;;  %v241_v14 = vld [vmem:[%s887_s3 + $0x10] sm:$0xff] }
  0x16   :  { %594 = vmatpush3.bf16.msra.mxu0 %v591_v3  ;;  %v239_v12 = vld [vmem:[%s887_s3] sm:$0xff]  ;;  %v240_v13 = vld [vmem:[%s887_s3 + $0x8] sm:$0xff]  ;;  %v242_v16 = vld [vmem:[%s887_s3 + $0x18] sm:$0xff] }
  0x17   :  { %596 = vmatprep.subr.bf16.mxu0 %v595_v6  ;;  %v599_v15 = vpack.c.bf16 %v240_v13, %v239_v12  ;;  %v603_v17 = vpack.c.bf16 %v242_v16, %v241_v14  ;;  %v243_v18 = vld [vmem:[%s887_s3 + $0x20] sm:$0xff]  ;;  %v244_v19 = vld [vmem:[%s887_s3 + $0x28] sm:$0xff]  ;;  %v245_v21 = vld [vmem:[%s887_s3 + $0x30] sm:$0xff] }
  0x18   :  { %v607_v20 = vpack.c.bf16 %v244_v19, %v243_v18  ;;  %v246_v22 = vld [vmem:[%s887_s3 + $0x38] sm:$0xff]  ;;  %v40_v51 = vld [vmem:[#allocation2] sm:$0xff]  ;;  %v41_v55 = vld [vmem:[#allocation2 + $0x8] sm:$0xff] }
  0x19   :  { %600 = vmatprep.subr.bf16.mxu1 %v599_v15  ;;  %v611_v23 = vpack.c.bf16 %v246_v22, %v245_v21  ;;  %v350_v18 = vld [vmem:[%s889_s5] sm:$0xff]  ;;  %v351_v19 = vld [vmem:[%s889_s5 + $0x8] sm:$0xff]  ;;  %v352_v21 = vld [vmem:[%s889_s5 + $0x10] sm:$0xff] }
  0x1a   :  { %598 = vmatpush3.bf16.msra.mxu0 %v595_v6  ;;  %602 = vmatpush3.bf16.msra.mxu1 %v599_v15  ;;  %v353_v22 = vld [vmem:[%s889_s5 + $0x18] sm:$0xff] }
  0x1b   :  { %604 = vmatprep.subr.bf16.mxu1 %v603_v17 }
  0x1d   :  { %553 = vmatmul.mubr.msk.f32.vlgmr.msra.gmra.mrb[0].mxu0 %vm52_vm0, %v43_v7 }
  0x1e   :  { %555 = vmatprep.mubr.msk.f32.mxu0 %vm52_vm0, %v44_v8  ;;  %606 = vmatpush3.bf16.msra.mxu1 %v603_v17 }
  0x1f   :  { %608 = vmatprep.subr.bf16.mxu1 %v607_v20 }
  0x21   :  { %556 = vmatmul.mubr.msk.f32.gmra.mrb[2].mxu0 %vm52_vm0, %v45_v9 }
  0x22   :  { %558 = vmatprep.mubr.msk.f32.mxu0 %vm52_vm0, %v46_v10  ;;  %610 = vmatpush3.bf16.msra.mxu1 %v607_v20  ;;  %v615_v20 = vpack.c.bf16 %v351_v19, %v350_v18 }
  0x23   :  { %612 = vmatprep.subr.bf16.mxu1 %v611_v23 }
  0x24   :  { %616 = vmatprep.subr.bf16.mxu0 %v615_v20 }
  0x25   :  { %559 = vmatmul.mubr.msk.f32.gmra.mrb[4].mxu0 %vm52_vm0, %v47_v11 }
  0x26   :  { %614 = vmatpush3.bf16.msra.mxu1 %v611_v23  ;;  %618 = vmatpush3.bf16.msra.mxu0 %v615_v20  ;;  %v619_v23 = vpack.c.bf16 %v353_v22, %v352_v21 }
  0x28   :  { %620 = vmatprep.subr.bf16.mxu0 %v619_v23 }
  0x2a   :  { %622 = vmatpush3.bf16.msra.mxu0 %v619_v23 }
  0xf0   :  { %v783_v24 = vpop.f32.mrb[0].mxu0 }
  0xf1   :  { %174 = vrot.lane.b32.xlu0 %v783_v24, %s668_s24  ;;  %v787_v25 = vpop.f32.mrb[1].mxu0  ;;  %v207_v26 = vmul.f32 %v783_v24, %v783_v24 }
  0xf2   :  { %v206_v27 = vmul.f32 %v787_v25, %v787_v25 }
  0xf3   :  { %v218_v32 = vsel %vm212_vm1, %v207_v26, 0.0  ;;  %v510_v26 = vld [vmem:[%s888_s4] ss:$0 sm:$0xff] }
  0xf4   :  { %v793_v28 = vpop.f32.mrb[2].mxu0  ;;  %v213_v34 = vsel %vm212_vm1, %v206_v27, 0.0 }
  0xf5   :  { %v209_v29 = vmul.f32 %v793_v28, %v793_v28  ;;  %172 = vrot.lane.b32.xlu0 %v787_v25, %s668_s24  ;;  %178 = vrot.lane.b32.xlu1 %v793_v28, %s668_s24  ;;  %v801_v30 = vpop.f32.mrb[3].mxu0 }
  0xf6   :  { %v208_v31 = vmul.f32 %v801_v30, %v801_v30 }
  0xf7   :  { %v219_v33 = vsel %vm212_vm1, %v209_v29, 0.0 }
  0xf8   :  { %v220_v35 = vadd.f32 %v219_v33, %v218_v32  ;;  %v214_v36 = vsel %vm212_vm1, %v208_v31, 0.0  ;;  %v809_v37 = vpop.f32.mrb[4].mxu0 }
  0xf9   :  { %v215_v38 = vadd.f32 %v214_v36, %v213_v34  ;;  %v211_v39 = vmul.f32 %v809_v37, %v809_v37  ;;  %176 = vrot.lane.b32.xlu1 %v801_v30, %s668_s24  ;;  %v815_v40 = vpop.f32.mrb[5].mxu0 }
  0xfa   :  { %v210_v41 = vmul.f32 %v815_v40, %v815_v40  ;;  %180 = vrot.lane.b32.xlu0 %v815_v40, %s668_s24 }
  0xfb   :  { %v221_v42 = vsel %vm212_vm1, %v211_v39, 0.0 }
  0xfc   :  { %v222_v43 = vadd.f32 %v221_v42, %v220_v35  ;;  %v216_v44 = vsel %vm212_vm1, %v210_v41, 0.0 }
  0xfd   :  { %v217_v45 = vadd.f32 %v216_v44, %v215_v38  ;;  %182 = vrot.lane.b32.xlu1 %v809_v37, %s668_s24 }
  0xfe   :  { %629 = vrsqrt.f32 %v222_v43  ;;  %vm232_vm2 = vcmp.eq.f32.partialorder %v222_v43, inf  ;;  %v235_v50 = vand.u32 2147483648, %v222_v43  ;;  %vm234_vm4 = vcmp.eq.f32.partialorder %v222_v43, 0.0 }
  0xff   :  { %631 = vrsqrt.f32 %v217_v45  ;;  %vm225_vm3 = vcmp.eq.f32.partialorder %v217_v45, inf  ;;  %v228_v52 = vand.u32 2147483648, %v217_v45  ;;  %vm227_vm5 = vcmp.eq.f32.partialorder %v217_v45, 0.0 }
 0x108   :  { %v630_v46 = vpop.eup %629 }
 0x109   :  { %v632_v47 = vpop.eup %631  ;;  %v231_v48 = vmul.f32 %v630_v46, %v222_v43 }
 0x10a   :  { %v224_v49 = vmul.f32 %v632_v47, %v217_v45 }
 0x10b   :  { %v233_v53 = vsel %vm232_vm2, %v222_v43, %v231_v48 }
 0x10c   :  { %v226_v54 = vsel %vm225_vm3, %v217_v45, %v224_v49  ;;  %v236_v56 = vsel %vm234_vm4, %v235_v50, %v233_v53  ;;  %v515_v45 = vld [vmem:[%s890_s6] ss:$0 sm:$0xff]  ;;  %s669_s6 = smov 64  }
 0x10d   :  { %v229_v57 = vsel %vm227_vm5, %v228_v52, %v226_v54  ;;  %v238_v59 = vsel %vm52_vm0, %v41_v55, %v236_v56 }
 0x10e   :  { %v237_v58 = vsel %vm52_vm0, %v40_v51, %v229_v57 }
 0x10f   :  { %577 = vmatprep.mubr.msk.f32.mxu1 %vm254_vm6, %v237_v58 }
 0x110   :  { %578 = vmatmul.mubr.msk.f32.vlgmr.msra.gmra.mrb[0].mxu1 %vm254_vm6, %v238_v59 }
 0x163   :  { %v175_v60 = vpop.permute.xlu0 %174 }
 0x164   :  { %v191_v61 = vmul.f32 %v783_v24, %v175_v60 }
 0x166   :  { %v201_v1 = vsel %vm52_vm0, %v191_v61, 0.0 }
 0x167   :  { %v173_v62 = vpop.permute.xlu0 %172  ;;  %v179_v63 = vpop.permute.xlu1 %178 }
 0x168   :  { %v193_v0 = vmul.f32 %v793_v28, %v179_v63  ;;  %v190_v2 = vmul.f32 %v173_v62, %v787_v25 }
 0x16a   :  { %v202_v3 = vsel %vm52_vm0, %v193_v0, 0.0  ;;  %v196_v9 = vsel %vm52_vm0, %v190_v2, 0.0 }
 0x16b   :  { %v203_v4 = vadd.f32 %v202_v3, %v201_v1  ;;  %v177_v5 = vpop.permute.xlu1 %176 }
 0x16c   :  { %v192_v6 = vmul.f32 %v177_v5, %v801_v30  ;;  %v181_v7 = vpop.permute.xlu0 %180 }
 0x16d   :  { %v194_v8 = vmul.f32 %v181_v7, %v815_v40 }
 0x16e   :  { %v197_v10 = vsel %vm52_vm0, %v192_v6, 0.0 }
 0x16f   :  { %v198_v11 = vadd.f32 %v197_v10, %v196_v9  ;;  %v199_v12 = vsel %vm52_vm0, %v194_v8, 0.0  ;;  %v183_v13 = vpop.permute.xlu1 %182 }
 0x170   :  { %v195_v14 = vmul.f32 %v809_v37, %v183_v13 }
 0x171   :  { %v840_v15 = vadd.f32 %v199_v12, %v198_v11 }
 0x172   :  { %v204_v16 = vsel %vm52_vm0, %v195_v14, 0.0 }
 0x173   :  { %v205_v17 = vadd.f32 %v204_v16, %v203_v4 }
 0x1e3   :  { %v579_v27 = vpop.f32.mrb[0].mxu1 }
 0x1e4   :  { %v333_v29 = vadd.f32 %v579_v27, %v510_v26  ;;  %v327_v31 = vpop.f32.mrb[1].mxu1 }
 0x1e5   :  { %v328_v32 = vadd.f32 %v510_v26, %v327_v31 }
 0x1e6   :  { %v514_v33 = vmul.f32 -1.442695, %v333_v29 }
 0x1e7   :  { %v513_v34 = vmul.f32 -1.442695, %v328_v32 }
 0x1e8   :  { %633 = vpow2.f32 %v514_v33 }
 0x1e9   :  { %635 = vpow2.f32 %v513_v34 }
 0x1f2   :  { %v634_v35 = vpop.eup %633 }
 0x1f3   :  { %v636_v36 = vpop.eup %635  ;;  %v343_v38 = vadd.f32 1.0, %v634_v35 }
 0x1f4   :  { %v342_v39 = vadd.f32 1.0, %v636_v36 }
 0x1f5   :  { %637 = vrcp.f32 %v343_v38 }
 0x1f6   :  { %639 = vrcp.f32 %v342_v39 }
 0x1ff   :  { %v638_v41 = vpop.eup %637 }
 0x200   :  { %v640_v42 = vpop.eup %639  ;;  %v349_v44 = vmul.f32 %v638_v41, %v333_v29 }
 0x201   :  { %v348_v43 = vmul.f32 %v640_v42, %v328_v32 }
 0x203   :  { %588 = vmatprep.mubr.msk.f32.mxu0 %vm52_vm0, %v348_v43 }
 0x204   :  { %589 = vmatmul.mubr.msk.f32.vlgmr.msra.gmra.mrb[6].mxu0 %vm52_vm0, %v349_v44 }
 0x2d7   :  { %v590_v46 = vpop.f32.mrb[6].mxu0 }
 0x2d8   :  { %v439_v47 = vadd.f32 %v590_v46, %v515_v45  ;;  %v433_v48 = vpop.f32.mrb[7].mxu0 }
 0x2d9   :  { %v434_v49 = vadd.f32 %v515_v45, %v433_v48 }
 0x2da   :  { %446 = vrot.lane.b32.xlu1 %v439_v47, %s668_s24  ;;  %v461_v50 = vmul.f32 %v783_v24, %v439_v47  ;;  %v463_v51 = vmul.f32 %v793_v28, %v439_v47  ;;  %v465_v52 = vmul.f32 %v809_v37, %v439_v47 }
 0x2db   :  { %444 = vrot.lane.b32.xlu0 %v434_v49, %s668_s24  ;;  %v460_v53 = vmul.f32 %v434_v49, %v787_v25  ;;  %v462_v54 = vmul.f32 %v434_v49, %v801_v30  ;;  %v464_v55 = vmul.f32 %v434_v49, %v815_v40 }
 0x2de   :  { %454 = vrot.lane.b32.xlu1 %v439_v47, %s669_s6 }
 0x2df   :  { %452 = vrot.lane.b32.xlu0 %v434_v49, %s669_s6 }
 0x2e2   :  { %470 = vrot.lane.b32.xlu1 %v461_v50, %s670_s10 }
 0x2e3   :  { %468 = vrot.lane.b32.xlu0 %v460_v53, %s670_s10 }
 0x2e6   :  { %478 = vrot.lane.b32.xlu1 %v463_v51, %s669_s6 }
 0x2e7   :  { %476 = vrot.lane.b32.xlu0 %v462_v54, %s669_s6 }
 0x2ea   :  { %486 = vrot.lane.b32.xlu1 %v465_v52, %s668_s24 }
 0x2eb   :  { %484 = vrot.lane.b32.xlu0 %v464_v55, %s668_s24 }
 0x34c   :  { %v447_v24 = vpop.permute.xlu1 %446 }
 0x34d   :  { %v445_v28 = vpop.permute.xlu0 %444  ;;  %v451_v57 = vmul.f32 %v447_v24, %v205_v17 }
 0x34e   :  { %v450_v40 = vmul.f32 %v445_v28, %v840_v15 }
 0x350   :  { %v455_v37 = vpop.permute.xlu1 %454 }
 0x351   :  { %v453_v25 = vpop.permute.xlu0 %452  ;;  %v459_v59 = vadd.f32 %v455_v37, %v451_v57 }
 0x352   :  { %v458_v61 = vadd.f32 %v453_v25, %v450_v40 }
 0x354   :  { %v471_v56 = vpop.permute.xlu1 %470 }
 0x355   :  { %v469_v30 = vpop.permute.xlu0 %468  ;;  %v491_v62 = vsel %vm52_vm0, %v459_v59, %v471_v56 }
 0x356   :  { %v490_v63 = vsel %vm52_vm0, %v458_v61, %v469_v30 }
 0x358   :  { %v479_v58 = vpop.permute.xlu1 %478 }
 0x359   :  { %v477_v60 = vpop.permute.xlu0 %476  ;;  %v493_v0 = vsel %vm254_vm6, %v491_v62, %v479_v58 }
 0x35a   :  { %v492_v2 = vsel %vm254_vm6, %v490_v63, %v477_v60 }
 0x35c   :  { %v487_v1 = vpop.permute.xlu1 %486 }
 0x35d   :  { %v496_v3 = vsel %vm494_vm7, %v493_v0, %v487_v1  ;;  %v485_v4 = vpop.permute.xlu0 %484 }
 0x35e   :  { %498 = vst [vmem:[%s891_s7 + $0x8] sm:$0xff] %v496_v3  ;;  %v495_v5 = vsel %vm494_vm7, %v492_v2, %v485_v4 }
 0x35f   :  { %497 = vst [vmem:[%s891_s7] sm:$0xff] %v495_v5 }
 0x360   :  { %503 = vsyncpa [#allocation3], 1 }

</bundles_post_ra>
